<compile_context>
chip_gen: v7x
topology: tpu7x:2x2x1
jax: 0.10.0
libtpu: 0.0.40
codegen_flags: <defaults>
</compile_context>

<pallas_src>
import functools

import jax
import jax.numpy as jnp
from jax import lax
from jax.experimental import pallas as pl
from jax.experimental.pallas import tpu as pltpu


def _ce_weighted_kernel(x_ref, t_ref, w_ref, o_ref, *, n_rows):
    """One grid step: (tile_n, C) logits tile -> weighted-CE partial sum.

    partial = sum_over_valid_rows( w * (logsumexp(x) - x[target]) ),
    written to lane 0 of this step's private (1, 128) output slab.
    """
    i = pl.program_id(0)
    tile_n, n_classes = x_ref.shape

    x = x_ref[...].astype(jnp.float32)          # (TN, C); no-op for f32 input
    t = t_ref[...]                              # (TN, 1) int32 class index
    w = w_ref[...].astype(jnp.float32)          # (TN, 1)

    # Validity mask for tail rows of the last (partial) block.  OOB rows may
    # hold arbitrary garbage (inf/nan), so every use below is a *select*.
    row = i * tile_n + lax.broadcasted_iota(jnp.int32, (tile_n, 1), 0)
    valid = row < n_rows                                            # (TN, 1)
    w_eff = jnp.where(valid, w, 0.0)                                # (TN, 1)

    # Numerically stable per-row logsumexp (two per-row cross-lane reduces).
    m = jnp.max(x, axis=-1, keepdims=True)                          # (TN, 1)
    se = jnp.sum(jnp.exp(x - m), axis=-1, keepdims=True)            # (TN, 1)
    lse = jnp.where(valid, m + jnp.log(se), 0.0)                    # (TN, 1)

    # Weighted picked-logit term: one-hot mask from a (1, C) iota broadcast
    # against (TN, 1) targets (no (TN, C) int32 iota materialized), folded
    # into a single whole-tile 2-D reduction (per-vreg VPU accumulation plus
    # one cross-lane reduce) instead of a third per-row XLU reduce.
    # NOTE: out-of-range targets silently contribute picked=0 (loss = lse);
    # PyTorch would raise instead.
    col = lax.broadcasted_iota(jnp.int32, (1, n_classes), 1)
    hit = (col == t) & valid                                        # (TN, C)
    picked_w = jnp.sum(jnp.where(hit, x, 0.0) * w_eff, keepdims=True)  # (1,1)

    part = jnp.sum(w_eff * lse, keepdims=True) - picked_w           # (1, 1)

    lane = lax.broadcasted_iota(jnp.int32, (1, 128), 1)
    o_ref[...] = jnp.where(lane == 0, part, jnp.zeros_like(part))   # (1, 128)


def _vmem_config():
    """(vmem_limit_bytes, per-tile byte budget) derived per TPU generation."""
    try:
        cap = int(pltpu.get_tpu_info().vmem_capacity_bytes)
    except Exception:
        cap = 128 * 1024 * 1024
    if cap <= 64 * 1024 * 1024:
        # v7x: 64 MiB of VMEM per TensorCore -> smaller scoped limit & tiles.
        return 48 * 1024 * 1024, 16 * 1024 * 1024
    # v5e / v6e: 128 MiB physical; raise the default scoped limit (16/32 MiB).
    return 64 * 1024 * 1024, 32 * 1024 * 1024


def _pick_tile_n(n, c, dtype, tile_budget_bytes):
    """Largest sublane-friendly row tile that fits the VMEM byte budget."""
    c_lanes = pl.cdiv(c, 128) * 128               # lane padding in VMEM
    itemsize = jnp.dtype(dtype).itemsize
    # Honest per-row VMEM bytes:
    #   * double-buffered logits input block           : 2 * itemsize * c_lanes
    #   * ~3 full-tile f32 temporaries (upcast copy,
    #     exp(x - m), masked/weighted picked tile)      : 12 * c_lanes
    #   * double-buffered (tile_n, 1) target + weight
    #     columns, each lane-padded to 128 lanes        : 2 * 2 * 4 * 128 = 2048
    per_row = 2 * itemsize * c_lanes + 12 * c_lanes + 2048
    cap = max(int(tile_budget_bytes) // per_row, 8)

    # Keep >= ~4 grid steps once the batch is large enough: megacore sharding
    # on v7x (2 TCs) and DMA/compute overlap need more than one step.
    min_steps = 4
    if n > min_steps * 512:
        cap = min(cap, pl.cdiv(n, min_steps))

    if n <= cap:
        return n                                  # whole batch in one tile
    if cap >= 128:
        return (cap // 128) * 128                 # lane/sublane friendly
    # Huge-C fallback: multiple of 32 is sublane-safe for f32/bf16/int8.
    # TODO(synk): add a C-axis grid with online logsumexp for LLM-vocab C.
    return max((cap // 32) * 32, 8)


def cross_entropy_loss_weighted(logits, target, weights, *, tile_n=None):
    """logits: [N, C] float; target: [N] int; weights: [N] -> mean(w * CE)."""
    n, c = logits.shape
    vmem_limit, tile_budget = _vmem_config()
    if tile_n is None:
        tile_n = _pick_tile_n(n, c, logits.dtype, tile_budget)
    else:
        tile_n = min(int(tile_n), n)
        if tile_n < n:
            tile_n = max((tile_n // 8) * 8, 8)    # keep the (8, .) constraint
    num_blocks = pl.cdiv(n, tile_n)

    t2 = target.astype(jnp.int32).reshape(n, 1)
    w2 = weights.reshape(n, 1)

    kernel = functools.partial(_ce_weighted_kernel, n_rows=n)

    out = pl.pallas_call(
        kernel,
        out_shape=jax.ShapeDtypeStruct((1, num_blocks * 128), jnp.float32),
        grid_spec=pltpu.PrefetchScalarGridSpec(
            num_scalar_prefetch=0,
            grid=(num_blocks,),
            in_specs=[
                pl.BlockSpec((tile_n, c), lambda i: (i, 0)),    # logits tile
                pl.BlockSpec((tile_n, 1), lambda i: (i, 0)),    # targets tile
                pl.BlockSpec((tile_n, 1), lambda i: (i, 0)),    # weights tile
            ],
            out_specs=pl.BlockSpec((1, 128), lambda i: (0, i)),  # per-step slab
        ),
        compiler_params=pltpu.CompilerParams(
            dimension_semantics=("parallel",),     # megacore-shardable on v7x
            vmem_limit_bytes=vmem_limit,
        ),
    )(logits, t2, w2)

    # Each block wrote its partial to lane 0 of its own slab; all other lanes
    # are exactly zero, so a flat sum is the cross-block reduction.
    return jnp.sum(out) / n                        # mean over N (not sum(w))


def _reference(logits, target, weights):
    x = logits.astype(jnp.float32)
    lse = jax.scipy.special.logsumexp(x, axis=-1)
    picked = jnp.take_along_axis(x, target[:, None].astype(jnp.int32),
                                 axis=-1)[:, 0]
    return jnp.mean((lse - picked) * weights.astype(jnp.float32))


if __name__ == "__main__":
    key = jax.random.PRNGKey(0)
    k1, k2, k3 = jax.random.split(key, 3)

    # Check 1: small f32 batch consistent with the module (single block).
    N, C = 16, 32
    logits = jax.random.normal(k1, (N, C), dtype=jnp.float32)
    target = jax.random.randint(k2, (N,), 0, C, dtype=jnp.int32)
    weights = jax.random.uniform(k3, (N,), dtype=jnp.float32)

    out = jax.block_until_ready(
        cross_entropy_loss_weighted(logits, target, weights))
    ref = _reference(logits, target, weights)
    assert jnp.allclose(out, ref, rtol=1e-5, atol=1e-6), (out, ref)

    # Check 2: bf16 logits, non-divisible batch, forced small tile so the
    # multi-block grid + tail-row masking path is exercised at small shapes.
    k4, k5, k6 = jax.random.split(k3, 3)
    N2, C2 = 1037, 96
    logits2 = jax.random.normal(k4, (N2, C2), dtype=jnp.bfloat16)
    target2 = jax.random.randint(k5, (N2,), 0, C2, dtype=jnp.int32)
    weights2 = jax.random.uniform(k6, (N2,), dtype=jnp.float32)

    out2 = jax.block_until_ready(
        cross_entropy_loss_weighted(logits2, target2, weights2, tile_n=256))
    ref2 = _reference(logits2, target2, weights2)
    assert jnp.allclose(out2, ref2, rtol=1e-4, atol=1e-4), (out2, ref2)

    # Check 3: automatic tile sizing (byte budget + >=4-step cap) with a tail.
    k7, k8, k9 = jax.random.split(k6, 3)
    N3, C3 = 4105, 32
    logits3 = jax.random.normal(k7, (N3, C3), dtype=jnp.float32)
    target3 = jax.random.randint(k8, (N3,), 0, C3, dtype=jnp.int32)
    weights3 = jax.random.uniform(k9, (N3,), dtype=jnp.float32)

    out3 = jax.block_until_ready(
        cross_entropy_loss_weighted(logits3, target3, weights3))
    ref3 = _reference(logits3, target3, weights3)
    assert jnp.allclose(out3, ref3, rtol=1e-4, atol=1e-5), (out3, ref3)

    print("KERNEL_OK")
</pallas_src>

<mosaic_0001>
module attributes {stable_mosaic.version = 11 : i64} {
  func.func @_ce_weighted_kernel(%arg0: i32, %arg1: memref<16x32xf32, #tpu.memory_space<vmem>>, %arg2: memref<16x1xi32, #tpu.memory_space<vmem>>, %arg3: memref<16x1xf32, #tpu.memory_space<vmem>>, %arg4: memref<1x128xf32, #tpu.memory_space<vmem>>) attributes {dimension_semantics = [#tpu.dimension_semantics<parallel>], iteration_bounds = array<i64: 1>, scalar_prefetch = 0 : i64, scratch_operands = 0 : i64, tpu.core_type = #tpu.core_type<tc>, window_params = [{transform_indices = @transform_0, window_bounds = array<i64: 16, 32>}, {transform_indices = @transform_1, window_bounds = array<i64: 16, 1>}, {transform_indices = @transform_2, window_bounds = array<i64: 16, 1>}, {transform_indices = @transform_3, window_bounds = array<i64: 1, 128>}]} {
    %c0 = arith.constant 0 : index
    %c0_0 = arith.constant 0 : index
    %0 = vector.load %arg1[%c0, %c0_0] : memref<16x32xf32, #tpu.memory_space<vmem>>, vector<16x32xf32>
    %c0_1 = arith.constant 0 : index
    %c0_2 = arith.constant 0 : index
    %1 = vector.load %arg2[%c0_1, %c0_2] : memref<16x1xi32, #tpu.memory_space<vmem>>, vector<16x1xi32>
    %c0_3 = arith.constant 0 : index
    %c0_4 = arith.constant 0 : index
    %2 = vector.load %arg3[%c0_3, %c0_4] : memref<16x1xf32, #tpu.memory_space<vmem>>, vector<16x1xf32>
    %c16_i32 = arith.constant 16 : i32
    %3 = arith.muli %arg0, %c16_i32 : i32
    %4 = tpu.iota {dimensions = array<i32: 0>} : vector<16x1xi32>
    %5 = vector.broadcast %3 : i32 to vector<16x1xi32>
    %6 = arith.addi %5, %4 : vector<16x1xi32>
    %c16_i32_5 = arith.constant 16 : i32
    %7 = vector.broadcast %c16_i32_5 : i32 to vector<16x1xi32>
    %8 = arith.cmpi slt, %6, %7 : vector<16x1xi32>
    %cst = arith.constant 0.000000e+00 : f32
    %9 = vector.broadcast %cst : f32 to vector<16x1xf32>
    %10 = arith.select %8, %2, %9 : vector<16x1xi1>, vector<16x1xf32>
    %cst_6 = arith.constant dense<0xFF800000> : vector<16xf32>
    %11 = vector.multi_reduction <maximumf>, %0, %cst_6 [1] : vector<16x32xf32> to vector<16xf32>
    %12 = vector.shape_cast %11 : vector<16xf32> to vector<16x1xf32>
    %13 = vector.broadcast %12 : vector<16x1xf32> to vector<16x32xf32>
    %14 = arith.subf %0, %13 : vector<16x32xf32>
    %15 = math.exp %14 : vector<16x32xf32>
    %cst_7 = arith.constant dense<0.000000e+00> : vector<16xf32>
    %16 = vector.multi_reduction <add>, %15, %cst_7 [1] : vector<16x32xf32> to vector<16xf32>
    %17 = vector.shape_cast %16 : vector<16xf32> to vector<16x1xf32>
    %18 = math.log %17 : vector<16x1xf32>
    %19 = arith.addf %12, %18 : vector<16x1xf32>
    %cst_8 = arith.constant 0.000000e+00 : f32
    %20 = vector.broadcast %cst_8 : f32 to vector<16x1xf32>
    %21 = arith.select %8, %19, %20 : vector<16x1xi1>, vector<16x1xf32>
    %22 = tpu.iota {dimensions = array<i32: 1>} : vector<1x32xi32>
    %23 = vector.broadcast %22 : vector<1x32xi32> to vector<16x32xi32>
    %24 = vector.broadcast %1 : vector<16x1xi32> to vector<16x32xi32>
    %25 = arith.cmpi eq, %23, %24 : vector<16x32xi32>
    %26 = vector.broadcast %8 : vector<16x1xi1> to vector<16x32xi1>
    %27 = arith.andi %25, %26 : vector<16x32xi1>
    %cst_9 = arith.constant 0.000000e+00 : f32
    %28 = vector.broadcast %cst_9 : f32 to vector<16x32xf32>
    %29 = arith.select %27, %0, %28 : vector<16x32xi1>, vector<16x32xf32>
    %30 = vector.broadcast %10 : vector<16x1xf32> to vector<16x32xf32>
    %31 = arith.mulf %29, %30 : vector<16x32xf32>
    %32 = vector.shape_cast %31 : vector<16x32xf32> to vector<1x16x32xf32>
    %cst_10 = arith.constant dense<0.000000e+00> : vector<1xf32>
    %33 = vector.multi_reduction <add>, %32, %cst_10 [1, 2] : vector<1x16x32xf32> to vector<1xf32>
    %34 = vector.shape_cast %33 : vector<1xf32> to vector<1x1x1xf32>
    %35 = vector.extract %34[0, 0, 0] : f32 from vector<1x1x1xf32>
    %36 = vector.broadcast %35 : f32 to vector<1x1xf32>
    %37 = arith.mulf %10, %21 : vector<16x1xf32>
    %38 = vector.shape_cast %37 : vector<16x1xf32> to vector<1x16x1xf32>
    %cst_11 = arith.constant dense<0.000000e+00> : vector<1xf32>
    %39 = vector.multi_reduction <add>, %38, %cst_11 [1, 2] : vector<1x16x1xf32> to vector<1xf32>
    %40 = vector.shape_cast %39 : vector<1xf32> to vector<1x1x1xf32>
    %41 = vector.extract %40[0, 0, 0] : f32 from vector<1x1x1xf32>
    %42 = vector.broadcast %41 : f32 to vector<1x1xf32>
    %43 = arith.subf %42, %36 : vector<1x1xf32>
    %44 = tpu.iota {dimensions = array<i32: 1>} : vector<1x128xi32>
    %c0_i32 = arith.constant 0 : i32
    %45 = vector.broadcast %c0_i32 : i32 to vector<1x128xi32>
    %46 = arith.cmpi eq, %44, %45 : vector<1x128xi32>
    %cst_12 = arith.constant 0.000000e+00 : f32
    %47 = vector.broadcast %cst_12 : f32 to vector<1x1xf32>
    %48 = vector.shape_cast %43 : vector<1x1xf32> to vector<1x1xf32>
    %49 = vector.broadcast %48 : vector<1x1xf32> to vector<1x128xf32>
    %50 = vector.shape_cast %47 : vector<1x1xf32> to vector<1x1xf32>
    %51 = vector.broadcast %50 : vector<1x1xf32> to vector<1x128xf32>
    %52 = arith.select %46, %49, %51 : vector<1x128xi1>, vector<1x128xf32>
    %c0_13 = arith.constant 0 : index
    %c0_14 = arith.constant 0 : index
    %53 = vector.load %arg4[%c0_13, %c0_14] : memref<1x128xf32, #tpu.memory_space<vmem>>, vector<1x128xf32>
    tpu.vector_store %arg4[%c0_13, %c0_14], %52 {strides = array<i32>} : memref<1x128xf32, #tpu.memory_space<vmem>>, vector<1x128xf32>,
    return
  }
  func.func @transform_0(%arg0: i32) -> (i32, i32) {
    %c0_i32 = arith.constant 0 : i32
    %c0_i32_0 = arith.constant 0 : i32
    return %arg0, %c0_i32 : i32, i32
  }
  func.func @transform_1(%arg0: i32) -> (i32, i32) {
    %c0_i32 = arith.constant 0 : i32
    %c0_i32_0 = arith.constant 0 : i32
    return %arg0, %c0_i32 : i32, i32
  }
  func.func @transform_2(%arg0: i32) -> (i32, i32) {
    %c0_i32 = arith.constant 0 : i32
    %c0_i32_0 = arith.constant 0 : i32
    return %arg0, %c0_i32 : i32, i32
  }
  func.func @transform_3(%arg0: i32) -> (i32, i32) {
    %c0_i32 = arith.constant 0 : i32
    %c0_i32_0 = arith.constant 0 : i32
    return %c0_i32, %arg0 : i32, i32
  }
}

</mosaic_0001>

<bundles_post_ra>
// kernel: tpu_custom_call.1
= control target key start
LH: loop header
LB: loop body
LE: loop exit
PB: predicated region body
PF: predicated region fallthrough
CT: control target
= control target key end

     0   :  { %8 = vsyncpa [#allocation3], 0  ;;  %s391_s0 = inlined_call_operand.hbm [shape: f32[16,32], index: 0, kind: input, shape index: {}]   ;;  %s392_s1 = inlined_call_operand.hbm [shape: s32[16,1], index: 1, kind: input, shape index: {}]   ;;  %s393_s2 = inlined_call_operand.hbm [shape: f32[16,1], index: 2, kind: input, shape index: {}]   ;;  %s394_s3 = inlined_call_operand.hbm [shape: f32[1,128], index: 3, kind: output, shape index: {}]  }
   0x1   :  { %9 = vsyncpa [#allocation6], 0 }
   0x2   :  { %10 = vsyncpa [#allocation4], 0  ;;  %s294_s12 = smov [#allocation5]   ;;  %s295_s14 = smov [#allocation2]  }
   0x3   :  { %s28_s13 = sshll.u32 %s294_s12, 4  ;;  %s16_s15 = sshll.u32 %s295_s14, 4  ;;  %s29_s13 = int_to_ptr.vmem [resolvable:$true] %s28_s13  ;;  %s321_s15 = int_to_ptr.vmem [resolvable:$true] %s16_s15 }
   0x4   :  { %s200_s18 = scalar_lea.hbm %s392_s1, 256 }
   0x5   :  { %p201_p0 = scmp.ne.s32.totalorder %s392_s1, %s200_s18  ;;  %p204_p1 = scmp.lt.u32.totalorder %s200_s18, %s392_s1 }
   0x7   :  { %p206_p2 = pnand %p204_p1, %p201_p0 }
   0x9   :  { %209 = shalt.err (!%p206_p2)
}
   0xa   :  { %s210_s23 = scalar_lea.vmem %s29_s13, 256  ;;  %p215_p4 = scmp.lt.s32.totalorder %s29_s13, %s29_s13 }
   0xb   :  { %p211_p3 = scmp.ne.s32.totalorder %s29_s13, %s210_s23  ;;  %p216_p5 = scmp.lt.s32.totalorder %s210_s23, %s210_s23 }
   0xd   :  { %p217_p6 = por %p216_p5, %p215_p4 }
   0xf   :  { %p218_p7 = pnand %p217_p6, %p211_p3 }
  0x11   :  { %221 = shalt.err (!%p218_p7)
}
  0x12   :  { %s296_s24 = smov 128   ;;  %s297_s25 = smov 8  }
  0x13   :  { %34 = dma.hbm_to_vmem [thread:$0]  %s392_s1, 256, %s29_s13, [#allocation6], %s296_s24, %s296_s24, %s297_s25  }
  0x14   :  { %s222_s30 = scalar_lea.hbm %s391_s0, 256 }
  0x15   :  { %p223_p8 = scmp.ne.s32.totalorder %s391_s0, %s222_s30  ;;  %p226_p9 = scmp.lt.u32.totalorder %s222_s30, %s391_s0 }
  0x17   :  { %p228_p10 = pnand %p226_p9, %p223_p8 }
  0x19   :  { %231 = shalt.err (!%p228_p10)
}
  0x1a   :  { %s232_s8 = scalar_lea.vmem %s321_s15, 256  ;;  %p237_p12 = scmp.lt.s32.totalorder %s321_s15, %s321_s15 }
  0x1b   :  { %p233_p11 = scmp.ne.s32.totalorder %s321_s15, %s232_s8  ;;  %p238_p13 = scmp.lt.s32.totalorder %s232_s8, %s232_s8 }
  0x1d   :  { %p239_p0 = por %p238_p13, %p237_p12 }
  0x1f   :  { %p240_p1 = pnand %p239_p0, %p233_p11 }
  0x21   :  { %243 = shalt.err (!%p240_p1)
}
  0x22   :  { %22 = dma.hbm_to_vmem [thread:$0]  %s391_s0, 256, %s321_s15, [#allocation3], %s296_s24, %s296_s24, %s297_s25  }
  0x23   :  { %s298_s10 = smov [#allocation7]   ;;  %s244_s14 = scalar_lea.hbm %s393_s2, 256 }
  0x24   :  { %s40_s11 = sshll.u32 %s298_s10, 4  ;;  %p245_p2 = scmp.ne.s32.totalorder %s393_s2, %s244_s14  ;;  %s41_s11 = int_to_ptr.vmem [resolvable:$true] %s40_s11 }
  0x25   :  { %p248_p3 = scmp.lt.u32.totalorder %s244_s14, %s393_s2 }
  0x27   :  { %p250_p4 = pnand %p248_p3, %p245_p2 }
  0x29   :  { %253 = shalt.err (!%p250_p4)
}
  0x2a   :  { %s254_s20 = scalar_lea.vmem %s41_s11, 256  ;;  %p259_p6 = scmp.lt.s32.totalorder %s41_s11, %s41_s11 }
  0x2b   :  { %p255_p5 = scmp.ne.s32.totalorder %s41_s11, %s254_s20  ;;  %p260_p7 = scmp.lt.s32.totalorder %s254_s20, %s254_s20 }
  0x2d   :  { %p261_p8 = por %p260_p7, %p259_p6 }
  0x2f   :  { %p262_p9 = pnand %p261_p8, %p255_p5 }
  0x31   :  { %265 = shalt.err (!%p262_p9)
}
  0x32   :  { %46 = dma.hbm_to_vmem [thread:$0]  %s393_s2, 256, %s41_s11, [#allocation6], %s296_s24, %s296_s24, %s297_s25  }
  0x33   :  { %288 = dma.done.wait [#allocation3], 256  }
  0x34   :  { %289 = vsyncadd [#allocation3], 4294967040 }
  0x35   :  { %290 = dma.done.wait [#allocation6], 512  }
  0x36   :  { %291 = vsyncadd [#allocation6], 4294966784  ;;  %v299_v0 = vmov 0   ;;  %vm73_vm0 = vcmask 261120   ;;  %v56_v1 = vld [vmem:[#allocation2] sm:$0xff]  ;;  %v57_v2 = vld [vmem:[#allocation2 + $0x8] sm:$0xff]  ;;  %v100_v20 = vlaneseq }
  0x37   :  { %191 = vset.pattern.permute.xlu1 %v299_v0  ;;  %190 = vset.pattern.permute.xlu0 %v299_v0  ;;  %v59_v3 = vld [vmem:[#allocation5 + $0x8] sm:$0xff]  ;;  %v74_v4 = vsel %vm73_vm0, %v56_v1, -inf  ;;  %v60_v5 = vld [vmem:[#allocation7] sm:$0xff]  ;;  %v77_v6 = vsel %vm73_vm0, %v57_v2, -inf  ;;  %v58_v7 = vld [vmem:[#allocation5] sm:$0xff]  ;;  %vm145_vm3 = vcmask 7168  }
  0x38   :  { %106 = vperm.xlu1 %191, %v59_v3   ;;  %75 = vmax.xlane.f32.xlu0 %v74_v4  ;;  %v61_v18 = vld [vmem:[#allocation7 + $0x8] sm:$0xff]  ;;  %v101_v22 = vand.u32 127, %v100_v20  ;;  %s300_s22 = smov [#allocation8]  }
  0x39   :  { %s169_s23 = sshll.u32 %s300_s22, 4  ;;  %s170_s23 = int_to_ptr.vmem [resolvable:$true] %s169_s23 }
  0x3a   :  { %vm160_vm4 = vcmp.eq.s32.totalorder %v101_v22, 0  ;;  %s266_s24 = scalar_lea.vmem %s170_s23, 16  ;;  %s270_s25 = scalar_lea.vmem %s170_s23, 32 }
  0x3b   :  { %p267_p10 = scmp.ne.s32.totalorder %s170_s23, %s266_s24  ;;  %p271_p11 = scmp.lt.s32.totalorder %s170_s23, %s170_s23 }
  0x3c   :  { %120 = vperm.xlu1 %191, %v60_v5   ;;  %78 = vmax.xlane.f32.xlu0 %v77_v6  ;;  %p272_p12 = scmp.lt.s32.totalorder %s270_s25, %s266_s24 }
  0x3e   :  { %p273_p13 = por %p272_p12, %p271_p11 }
  0x40   :  { %p274_p0 = pnand %p273_p13, %p267_p10 }
  0x52   :  { %103 = vperm.xlu0 %190, %v58_v7  }
  0xb7   :  { %v107_v19 = vpop.permute.xlu1 %106 }
  0xb8   :  { %vm109_vm2 = vcmp.eq.s32.totalorder %v101_v22, %v107_v19 }
  0xb9   :  { %v117_v28 = vsel %vm109_vm2, %v57_v2, 0.0 }
  0xbb   :  { %v121_v21 = vpop.permute.xlu1 %120 }
  0xc5   :  { %v76_v8 = vpop.xlane.xlu0 %75 }
  0xc6   :  { %v80_v9 = vsub.f32 %v56_v1, %v76_v8 }
  0xc8   :  { %v82_v10 = vmul.f32 1.442695, %v80_v9 }
  0xc9   :  { %v79_v11 = vpop.xlane.xlu0 %78 }
  0xca   :  { %192 = vpow2.f32 %v82_v10  ;;  %v81_v12 = vsub.f32 %v57_v2, %v79_v11 }
  0xcc   :  { %v84_v13 = vmul.f32 1.442695, %v81_v12 }
  0xce   :  { %194 = vpow2.f32 %v84_v13 }
  0xd1   :  { %v104_v23 = vpop.permute.xlu0 %103 }
  0xd2   :  { %vm108_vm1 = vcmp.eq.s32.totalorder %v101_v22, %v104_v23 }
  0xd3   :  { %v116_v25 = vsel %vm108_vm1, %v56_v1, 0.0 }
  0xd4   :  { %v193_v14 = vpop.eup %192  ;;  %v128_v27 = vmul.f32 %v121_v21, %v116_v25 }
  0xd5   :  { %v86_v15 = vsel %vm73_vm0, %v193_v14, 0.0 }
  0xd6   :  { %87 = vadd.xlane.f32.xlu1 %v86_v15  ;;  %v130_v32 = vsel %vm73_vm0, %v128_v27, 0.0 }
  0xd8   :  { %v195_v16 = vpop.eup %194 }
  0xd9   :  { %v89_v17 = vsel %vm73_vm0, %v195_v16, 0.0 }
  0xda   :  { %90 = vadd.xlane.f32.xlu1 %v89_v17 }
  0xeb   :  { %125 = vperm.xlu1 %191, %v61_v18  }
 0x163   :  { %v88_v24 = vpop.xlane.xlu1 %87 }
 0x164   :  { %196 = vlog2.f32 %v88_v24 }
 0x167   :  { %v91_v26 = vpop.xlane.xlu1 %90 }
 0x168   :  { %198 = vlog2.f32 %v91_v26 }
 0x16b   :  { %v126_v29 = vpop.permute.xlu1 %125 }
 0x16c   :  { %v129_v30 = vmul.f32 %v126_v29, %v117_v28 }
 0x16e   :  { %v197_v31 = vpop.eup %196  ;;  %v131_v33 = vsel %vm73_vm0, %v129_v30, 0.0 }
 0x16f   :  { %v93_v34 = vmul.f32 0.6931472, %v197_v31  ;;  %v132_v35 = vadd.f32 %v131_v33, %v130_v32 }
 0x171   :  { %v96_v36 = vadd.f32 %v93_v34, %v76_v8  ;;  %133 = vadd.xlane.f32.xlu1 %v132_v35 }
 0x172   :  { %v199_v37 = vpop.eup %198 }
 0x173   :  { %v95_v38 = vmul.f32 0.6931472, %v199_v37  ;;  %v143_v40 = vmul.f32 %v96_v36, %v60_v5 }
 0x175   :  { %v97_v39 = vadd.f32 %v95_v38, %v79_v11  ;;  %v146_v42 = vsel %vm145_vm3, %v143_v40, 0.0 }
 0x177   :  { %v144_v41 = vmul.f32 %v97_v39, %v61_v18 }
 0x179   :  { %v147_v43 = vsel %vm145_vm3, %v144_v41, 0.0 }
 0x17a   :  { %v148_v44 = vadd.f32 %v147_v43, %v146_v42 }
 0x17c   :  { %149 = vadd.xlane.f32.xlu0 %v148_v44 }
 0x1fe   :  { %v134_v45 = vpop.xlane.xlu1 %133 }
 0x1ff   :  { %v135_v46 = vrot.slane %v134_v45, 4 }
 0x201   :  { %v136_v47 = vadd.f32 %v135_v46, %v134_v45 }
 0x203   :  { %v137_v48 = vrot.slane %v136_v47, 2 }
 0x205   :  { %v138_v49 = vadd.f32 %v137_v48, %v136_v47 }
 0x207   :  { %v139_v50 = vrot.slane %v138_v49, 1 }
 0x209   :  { %v150_v51 = vpop.xlane.xlu0 %149  ;;  %v140_v52 = vadd.f32 %v139_v50, %v138_v49 }
 0x20a   :  { %v151_v53 = vrot.slane %v150_v51, 4 }
 0x20b   :  { %179 = vpush %v140_v52 }
 0x20c   :  { %v152_v54 = vadd.f32 %v151_v53, %v150_v51 }
 0x20e   :  { %v153_v55 = vrot.slane %v152_v54, 2 }
 0x210   :  { %v154_v56 = vadd.f32 %v153_v55, %v152_v54 }
 0x212   :  { %v155_v57 = vrot.slane %v154_v56, 1 }
 0x214   :  { %v156_v58 = vadd.f32 %v155_v57, %v154_v56 }
 0x216   :  { %181 = vpush %v156_v58 }
 0x23c   :  { %s180_s2 = spop %179 }
 0x23d   :  { %v142_v59 = vstv %s180_s2 }
 0x247   :  { %s182_s21 = spop %181 }
 0x248   :  { %v158_v60 = vstv %s182_s21 }
 0x249   :  { %v159_v61 = vsub.f32 %v158_v60, %v142_v59 }
 0x24b   :  { %v161_v62 = vsel %vm160_vm4, %v159_v61, 0.0 }
 0x24c   :  { %162 = vst [vmem:[#allocation8] sm:$0x1] %v161_v62 }
 0x24d   :  { %277 = shalt.err (!%p274_p0)
}
 0x24e   :  { %s278_s28 = scalar_lea.hbm %s394_s3, 16 }
 0x24f   :  { %p279_p1 = scmp.ne.s32.totalorder %s394_s3, %s278_s28  ;;  %p282_p2 = scmp.lt.u32.totalorder %s278_s28, %s394_s3 }
 0x251   :  { %p284_p3 = pnand %p282_p2, %p279_p1 }
 0x253   :  { %287 = shalt.err (!%p284_p3)
}
 0x254   :  { %172 = dma.vmem_to_hbm [thread:$0]  %s170_s23, 16, %s394_s3, [#allocation4]  }
 0x255   :  { %292 = dma.done.wait [#allocation4], 16  }
 0x256   :  { %293 = vsyncadd [#allocation4], 4294967280 }
 0x257   :  { %176 = vsyncpa [#allocation3], 1 }
 0x258   :  { %177 = vsyncpa [#allocation6], 1 }
 0x259   :  { %178 = vsyncpa [#allocation4], 1 }

</bundles_post_ra>
